<compile_context>
chip_gen: v7x
topology: tpu7x:2x2x1
jax: 0.10.0
libtpu: 0.0.40
codegen_flags: <defaults>
</compile_context>

<pallas_src>
import math
from typing import NamedTuple, Optional

import jax
import jax.numpy as jnp
from jax.experimental import pallas as pl
from jax.experimental.pallas import tpu as pltpu

_MiB = 1024 * 1024


# ---------------------------------------------------------------------------
# hardware introspection (best effort; safe fallbacks)
# ---------------------------------------------------------------------------
def _tpu_generation() -> Optional[int]:
    try:
        kind = jax.devices()[0].device_kind.lower()
    except Exception:
        return None
    for g in (7, 6, 5, 4):
        if f"v{g}" in kind or f"tpu{g}" in kind:
            return g
    return None


def _vmem_capacity_bytes(gen: Optional[int]) -> int:
    try:
        cap = int(getattr(pltpu.get_tpu_info(), "vmem_capacity_bytes"))
        if cap > 0:
            return cap
    except Exception:
        pass
    if gen == 7:
        return 64 * _MiB
    if gen in (5, 6):
        return 128 * _MiB
    return 64 * _MiB  # conservative default for unknown chips


def _lane_multiple(gen: Optional[int]) -> int:
    # v6e / v7x MXU is 2x256x256 -> prefer 256-wide N/K tiles; v5e is 4x128x128.
    return 256 if gen in (6, 7) else 128


def _default_blocks(gen: Optional[int]):
    # (block_m, block_n, block_k) caps; clamped to the problem size below.
    if gen == 6:
        return 1024, 1536, 512
    if gen == 7:
        return 1024, 1024, 512
    return 512, 512, 512  # v5e / unknown


# ---------------------------------------------------------------------------
# kernels
# ---------------------------------------------------------------------------
def _linear_kernel_acc(x_ref, w_ref, b_ref, o_ref, acc_ref):
    """One (tm, tn) output tile; reduction over the last ("arbitrary") K axis."""
    k = pl.program_id(2)
    prod = jnp.dot(x_ref[...], w_ref[...], preferred_element_type=jnp.float32)

    @pl.when(k == 0)
    def _():
        acc_ref[...] = prod  # direct write: no zero store + readback

    @pl.when(k > 0)
    def _():
        acc_ref[...] += prod

    @pl.when(k == pl.num_programs(2) - 1)
    def _():
        # Bias added exactly once per output tile, in the finalize branch.
        o_ref[...] = (acc_ref[...] + b_ref[...]).astype(o_ref.dtype)


def _linear_kernel_noacc(x_ref, w_ref, b_ref, o_ref):
    """Whole K in one step: write the output tile directly (no scratch)."""
    o_ref[...] = (
        jnp.dot(x_ref[...], w_ref[...], preferred_element_type=jnp.float32)
        + b_ref[...]
    ).astype(o_ref.dtype)


# ---------------------------------------------------------------------------
# tiling helpers
# ---------------------------------------------------------------------------
def _round_up(x, m):
    return ((x + m - 1) // m) * m


def _tile_for(dim_padded, cap, mult):
    """Largest multiple of `mult`, <= cap, that divides `dim_padded`."""
    if dim_padded <= cap:
        return dim_padded
    t = max(mult, (cap // mult) * mult)
    while dim_padded % t:
        t -= mult
    return t


def _shrink_tile(t, mult):
    """Largest multiple of `mult` that strictly divides t (falls back to mult)."""
    c = ((t - 1) // mult) * mult
    while c >= mult:
        if t % c == 0:
            return c
        c -= mult
    return mult


def _footprint_bytes(tm, tn, tk, in_item, out_item):
    return (2 * (tm * tk + tk * tn) * in_item   # double-buffered x / w tiles
            + 2 * tm * tn * out_item            # double-buffered output tile
            + tm * tn * 4                       # f32 accumulator scratch
            + 2 * tn * 4)                       # bias tile


# ---------------------------------------------------------------------------
# parameter preparation (hoists per-call pad + cast out of the hot path)
# ---------------------------------------------------------------------------
class PreparedLinear(NamedTuple):
    wp: jax.Array      # (Kp, Np) compute dtype, zero padded to lane multiples
    bp: jax.Array      # (1, Np)  float32, zero padded
    in_features: int
    out_features: int


def prepare_linear_params(w, b, *, compute_dtype=jnp.bfloat16):
    """Cast + lane-pad static Linear weights ONCE; pass the result as `w`."""
    gen = _tpu_generation()
    lane = _lane_multiple(gen)
    K, N = w.shape
    Kp, Np = _round_up(K, lane), _round_up(N, lane)
    wp = w.astype(compute_dtype)
    if (Kp, Np) != (K, N):
        wp = jnp.pad(wp, ((0, Kp - K), (0, Np - N)))
    bp = b.astype(jnp.float32)
    if Np != N:
        bp = jnp.pad(bp, (0, Np - N))
    return PreparedLinear(wp=wp, bp=bp.reshape(1, Np),
                          in_features=K, out_features=N)


# ---------------------------------------------------------------------------
# forward pass
# ---------------------------------------------------------------------------
def linear_forward(x, w, b=None, *, block_m=None, block_n=None, block_k=None,
                   compute_dtype=None, out_dtype=None, trim_output=True):
    """y = x @ w + b  (Linear.forward) via a tiled Pallas TPU kernel.

    x: (M, K).  `w` is either the raw (K, N) weight (with b of shape (N,)) or
    a PreparedLinear from prepare_linear_params().  Returns (M, N) in x.dtype
    unless out_dtype is given.

    compute_dtype defaults to bf16 operands for f32 inputs (f32 MXU
    accumulation); pass jnp.float32 for full-precision operands.
    """
    M, K_x = x.shape
    gen = _tpu_generation()
    lane = _lane_multiple(gen)

    prepared = isinstance(w, PreparedLinear)
    if prepared:
        K, N = w.in_features, w.out_features
        assert K_x == K, "inner dims must match"
        wp_full, bp_full = w.wp, w.bp
        Kp, Np = wp_full.shape
        compute_dtype = wp_full.dtype    # prepared weights fix the operand dtype
    else:
        K, N = w.shape
        assert K_x == K, "inner dims must match"
        assert b is not None and b.shape == (N,), "bias must be (out_features,)"
        if compute_dtype is None:
            # bf16 operands (f32 accumulation) by default: the MXU is
            # bf16-native on v5e/v6e/v7x; f32 operands are ~3x slower and
            # double the x/w DMA bytes.
            compute_dtype = jnp.bfloat16 if x.dtype == jnp.float32 else x.dtype
        Kp, Np = _round_up(K, lane), _round_up(N, lane)

    out_dtype = x.dtype if out_dtype is None else out_dtype
    in_item = jnp.dtype(compute_dtype).itemsize
    out_item = jnp.dtype(out_dtype).itemsize

    # ---- tile plan ---------------------------------------------------------
    dbm, dbn, dbk = _default_blocks(gen)
    block_m = dbm if block_m is None else block_m
    block_n = dbn if block_n is None else block_n
    block_k = dbk if block_k is None else block_k

    m_mult = 8 * max(1, 4 // in_item)        # 8 (f32), 16 (bf16), 32 (8-bit)
    Mp = _round_up(M, m_mult)
    cap_m = max(m_mult, (block_m // m_mult) * m_mult)
    cap_n = max(lane, (block_n // lane) * lane)
    cap_k = max(lane, (block_k // lane) * lane)

    tm = _tile_for(Mp, cap_m, m_mult)
    tn = _tile_for(Np, cap_n, lane)
    tk = _tile_for(Kp, cap_k, lane)

    # ---- shrink tiles until the double-buffered footprint fits VMEM ---------
    capacity = _vmem_capacity_bytes(gen)
    budget = max(capacity - 16 * _MiB, capacity // 2)   # headroom for compiler
    for _ in range(64):
        if _footprint_bytes(tm, tn, tk, in_item, out_item) <= budget:
            break
        if tk > max(512, lane):
            tk = _shrink_tile(tk, lane)      # keep tk >= 512 while possible
        elif tm >= tn and tm > m_mult:
            tm = _shrink_tile(tm, m_mult)
        elif tn > lane:
            tn = _shrink_tile(tn, lane)
        elif tk > lane:
            tk = _shrink_tile(tk, lane)
        elif tm > m_mult:
            tm = _shrink_tile(tm, m_mult)
        else:
            break

    # ---- v7x megacore: keep >= 2 output tiles so both TensorCores get work --
    if gen == 7:
        for _ in range(16):
            if (Mp // tm) * (Np // tn) >= 2:
                break
            if tm > m_mult:
                tm = _shrink_tile(tm, m_mult)
            elif tn > lane:
                tn = _shrink_tile(tn, lane)
            else:
                break

    gm, gn, gk = Mp // tm, Np // tn, Kp // tk
    fp = _footprint_bytes(tm, tn, tk, in_item, out_item)
    vmem_limit = int(min(max(budget, fp), max(fp + 8 * _MiB, 32 * _MiB)))

    # ---- tiny problem: single block, no grid, no padding ---------------------
    if gm == 1 and gn == 1 and gk == 1:
        x_in = x.astype(compute_dtype)
        if prepared:
            if Kp != K:
                x_in = jnp.pad(x_in, ((0, 0), (0, Kp - K)))
            w_in, b_in = wp_full, bp_full
        else:
            w_in = w.astype(compute_dtype)
            b_in = b.astype(jnp.float32).reshape(1, N)
        y = pl.pallas_call(
            _linear_kernel_noacc,
            out_shape=jax.ShapeDtypeStruct((M, w_in.shape[1]), out_dtype),
        )(x_in, w_in, b_in)
        if trim_output and y.shape[1] != N:
            y = y[:, :N]
        return y

    # ---- pad / cast operands (skipped when already aligned; weights can be
    #      pre-padded once via prepare_linear_params) --------------------------
    xp = x.astype(compute_dtype)
    if (Mp, Kp) != (M, K):
        xp = jnp.pad(xp, ((0, Mp - M), (0, Kp - K)))
    if prepared:
        w_in, b_in = wp_full, bp_full
    else:
        w_in = w.astype(compute_dtype)
        if (Kp, Np) != (K, N):
            w_in = jnp.pad(w_in, ((0, Kp - K), (0, Np - N)))
        b_in = b.astype(jnp.float32)
        if Np != N:
            b_in = jnp.pad(b_in, (0, Np - N))
        b_in = b_in.reshape(1, Np)

    cost = pl.CostEstimate(
        flops=2 * Mp * Np * Kp,
        transcendentals=0,
        # include re-streaming: every x tile is read gn times, every w tile gm
        # times -- that is what actually hits HBM with this tiling.
        bytes_accessed=(in_item * (Mp * Kp * gn + Kp * Np * gm)
                        + out_item * Mp * Np + 4 * Np * gm),
    )

    if gk == 1:
        # Whole K fits one tile: 2-D grid, no accumulator round-trip.
        y = pl.pallas_call(
            _linear_kernel_noacc,
            out_shape=jax.ShapeDtypeStruct((Mp, Np), out_dtype),
            grid_spec=pltpu.PrefetchScalarGridSpec(
                num_scalar_prefetch=0,
                grid=(gm, gn),
                in_specs=[
                    pl.BlockSpec((tm, Kp), lambda i, j: (i, 0)),
                    pl.BlockSpec((Kp, tn), lambda i, j: (0, j)),
                    pl.BlockSpec((1, tn), lambda i, j: (0, j)),
                ],
                out_specs=pl.BlockSpec((tm, tn), lambda i, j: (i, j)),
            ),
            compiler_params=pltpu.CompilerParams(
                dimension_semantics=("parallel", "parallel"),
                vmem_limit_bytes=vmem_limit),
            cost_estimate=cost,
        )(xp, w_in, b_in)
    else:
        # NOTE: if profiling ever shows exposed x/w DMA at the chosen tile
        # size, deepen input buffering with pipeline_mode=pl.Buffered(3) on
        # the x/w BlockSpecs (costs one extra input tile of VMEM each).
        y = pl.pallas_call(
            _linear_kernel_acc,
            out_shape=jax.ShapeDtypeStruct((Mp, Np), out_dtype),
            grid_spec=pltpu.PrefetchScalarGridSpec(
                num_scalar_prefetch=0,
                grid=(gm, gn, gk),
                in_specs=[
                    pl.BlockSpec((tm, tk), lambda i, j, k: (i, k)),
                    pl.BlockSpec((tk, tn), lambda i, j, k: (k, j)),
                    pl.BlockSpec((1, tn), lambda i, j, k: (0, j)),
                ],
                out_specs=pl.BlockSpec((tm, tn), lambda i, j, k: (i, j)),
                scratch_shapes=[pltpu.VMEM((tm, tn), jnp.float32)],
            ),
            compiler_params=pltpu.CompilerParams(
                dimension_semantics=("parallel", "parallel", "arbitrary"),
                vmem_limit_bytes=vmem_limit),
            cost_estimate=cost,
        )(xp, w_in, b_in)

    if trim_output and (Mp, Np) != (M, N):
        y = y[:M, :N]
    return y


def init_linear_params(key, start_dim, end_dim, activation_function="TanH"):
    """Deterministic re-implementation of Linear.__init__ parameter init."""
    if activation_function == "TanH":
        std = math.sqrt(1.0 / (start_dim + end_dim))
    else:
        std = math.sqrt(2.0 / (start_dim + end_dim))
    kw, kb = jax.random.split(key)
    w = std * jax.random.normal(kw, (start_dim, end_dim), dtype=jnp.float32)
    b = std * jax.random.normal(kb, (end_dim,), dtype=jnp.float32)
    return w, b


# TODO(synk): backward / param / zero_grad of the PyTorch module are training
# plumbing, not part of the forward pass, and are intentionally not ported.

if __name__ == "__main__":
    key = jax.random.PRNGKey(0)
    k1, k2, k3, k4 = jax.random.split(key, 4)

    # --- the module's typical tiny use: batch=8, Linear(32 -> 16) ------------
    # (takes the single-block, no-grid fast path)
    x = jax.random.normal(k1, (8, 32), dtype=jnp.float32)
    w, b = init_linear_params(k2, 32, 16, activation_function="TanH")
    y_ref = jnp.dot(x, w, precision=jax.lax.Precision.HIGHEST) + b

    y = linear_forward(x, w, b)                       # bf16 operands (default)
    jax.block_until_ready(y)
    assert y.shape == (8, 16)
    assert jnp.allclose(y, y_ref, atol=5e-2, rtol=5e-2)

    y_f32 = linear_forward(x, w, b, compute_dtype=jnp.float32)
    jax.block_until_ready(y_f32)
    assert jnp.allclose(y_f32, y_ref, atol=1e-4, rtol=1e-4)

    # --- multi-tile case: exercises the K-reduction accumulator path ---------
    x2 = jax.random.normal(k3, (256, 1536), dtype=jnp.float32)
    w2, b2 = init_linear_params(k4, 1536, 512, activation_function="ReLU")
    y2_ref = jnp.dot(x2, w2, precision=jax.lax.Precision.HIGHEST) + b2

    y2_f32 = linear_forward(x2, w2, b2, compute_dtype=jnp.float32)
    jax.block_until_ready(y2_f32)
    assert y2_f32.shape == (256, 512)
    assert jnp.allclose(y2_f32, y2_ref, atol=2e-3, rtol=2e-3)

    # default bf16 operand path + pre-prepared (padded/cast once) weights
    y2 = linear_forward(x2, w2, b2)
    prep = prepare_linear_params(w2, b2)
    y2_prep = linear_forward(x2, prep)
    jax.block_until_ready((y2, y2_prep))
    assert jnp.allclose(y2, y2_ref, atol=5e-2, rtol=5e-2)
    assert jnp.allclose(y2_prep, y2_ref, atol=5e-2, rtol=5e-2)

    print("KERNEL_OK")
</pallas_src>

<mosaic_0001>
module attributes {stable_mosaic.version = 11 : i64} {
  func.func @_linear_kernel_noacc(%arg0: memref<8x32xbf16, #tpu.memory_space<vmem>>, %arg1: memref<32x16xbf16, #tpu.memory_space<vmem>>, %arg2: memref<1x16xf32, #tpu.memory_space<vmem>>, %arg3: memref<8x16xf32, #tpu.memory_space<vmem>>) attributes {dimension_semantics = [], scalar_prefetch = 0 : i64, scratch_operands = 0 : i64, tpu.core_type = #tpu.core_type<tc>} {
    %c0 = arith.constant 0 : index
    %c0_0 = arith.constant 0 : index
    %0 = vector.load %arg0[%c0, %c0_0] : memref<8x32xbf16, #tpu.memory_space<vmem>>, vector<8x32xbf16>
    %c0_1 = arith.constant 0 : index
    %c0_2 = arith.constant 0 : index
    %1 = vector.load %arg1[%c0_1, %c0_2] : memref<32x16xbf16, #tpu.memory_space<vmem>>, vector<32x16xbf16>
    %cst = arith.constant dense<0.000000e+00> : vector<8x16xf32>
    %2 = tpu.matmul %0, %1, %cst {dimension_numbers = #tpu.dot_dimension_numbers<[1], [0], [0], [1], [0, 0, 1, 1], [], []>} : vector<8x32xbf16>, vector<32x16xbf16>, vector<8x16xf32> -> vector<8x16xf32>
    %c0_3 = arith.constant 0 : index
    %c0_4 = arith.constant 0 : index
    %3 = vector.load %arg2[%c0_3, %c0_4] : memref<1x16xf32, #tpu.memory_space<vmem>>, vector<1x16xf32>
    %4 = vector.broadcast %3 : vector<1x16xf32> to vector<8x16xf32>
    %5 = arith.addf %2, %4 : vector<8x16xf32>
    %c0_5 = arith.constant 0 : index
    %c0_6 = arith.constant 0 : index
    %6 = vector.load %arg3[%c0_5, %c0_6] : memref<8x16xf32, #tpu.memory_space<vmem>>, vector<8x16xf32>
    tpu.vector_store %arg3[%c0_5, %c0_6], %5 {strides = array<i32>} : memref<8x16xf32, #tpu.memory_space<vmem>>, vector<8x16xf32>,
    return
  }
}

</mosaic_0001>

<bundles_post_ra>
// kernel: tpu_custom_call.1
= control target key start
LH: loop header
LB: loop body
LE: loop exit
PB: predicated region body
PF: predicated region fallthrough
CT: control target
= control target key end

     0   :  { %v144_v1 = vmov 0.0   ;;  %vm145_vm0 = vmmov 0   ;;  %s191_s0 = inlined_call_operand.vmem [shape: bf16[8,32], index: 0, kind: input, shape index: {}]   ;;  %s192_s1 = inlined_call_operand.vmem [shape: bf16[32,16], index: 1, kind: input, shape index: {}]   ;;  %s193_s2 = inlined_call_operand.vmem [shape: f32[1,16], index: 2, kind: input, shape index: {}]   ;;  %s194_s3 = inlined_call_operand.hbm [shape: f32[8,16], index: 3, kind: output, shape index: {}]  }
   0x1   :  { %v118_v0 = vld [vmem:[%s192_s1] sm:$0xff]   ;;  %107 = vmatprep.subr.bf16.mxu0 %v144_v1  ;;  %v119_v2 = vld [vmem:[%s192_s1 + $0x8] sm:$0xff]   ;;  %111 = vmatprep.mubr.msk.bf16.mxu0 %vm145_vm0, %v144_v1 }
   0x2   :  { %108 = vmatpush3.bf16.msra.mxu0 %v118_v0 }
   0x3   :  { %109 = vmatprep.subr.bf16.mxu0 %v144_v1 }
   0x4   :  { %8 = vsyncpa [#allocation3], 0  ;;  %v16_v3 = vld [vmem:[%s191_s0] sm:$0xf]  ;;  %vm40_vm1 = vcmask 261120   ;;  %s146_s20 = smov [#allocation2]  }
   0x5   :  { %v100_v4 = vld [vmem:[%s193_s2] ss:$0 sm:$0xff]  ;;  %s92_s21 = sshll.u32 %s146_s20, 4  ;;  %vm84_vm2 = vcmask 130048   ;;  %s93_s21 = int_to_ptr.vmem [resolvable:$true] %s92_s21 }
   0x6   :  { %110 = vmatpush3.bf16.msra.mxu0 %v119_v2  ;;  %s120_s1 = scalar_lea.vmem %s93_s21, 128  ;;  %p125_p1 = scmp.lt.s32.totalorder %s93_s21, %s93_s21 }
   0x7   :  { %p121_p0 = scmp.ne.s32.totalorder %s93_s21, %s120_s1  ;;  %p126_p2 = scmp.lt.s32.totalorder %s120_s1, %s120_s1 }
   0x9   :  { %112 = vmatmul.mubr.msk.bf16.vlgmr.msra.gmra.mrb[0].mxu0 %vm40_vm1, %v16_v3  ;;  %p127_p3 = por %p126_p2, %p125_p1 }
   0xb   :  { %p128_p4 = pnand %p127_p3, %p121_p0 }
  0xdc   :  { %v78_v5 = vpop.f32.mrb[0].mxu0 }
  0xdd   :  { %v79_v6 = vadd.f32 %v100_v4, %v78_v5  ;;  %v113_v7 = vpop.f32.mrb[1].mxu0 }
  0xde   :  { %v81_v8 = vpop.f32.mrb[2].mxu0 }
  0xdf   :  { %v114_v9 = vpop.f32.mrb[3].mxu0  ;;  %85 = vst.msk [vmem:[#allocation2] sm:$0xff] %vm84_vm2, %v79_v6 }
  0xe0   :  { %131 = shalt.err (!%p128_p4)
}
  0xe1   :  { %s132_s2 = scalar_lea.hbm %s194_s3, 128 }
  0xe2   :  { %p133_p5 = scmp.ne.s32.totalorder %s194_s3, %s132_s2  ;;  %p136_p6 = scmp.lt.u32.totalorder %s132_s2, %s194_s3 }
  0xe4   :  { %p138_p7 = pnand %p136_p6, %p133_p5 }
  0xe6   :  { %141 = shalt.err (!%p138_p7)
}
  0xe7   :  { %95 = dma.vmem_to_hbm [thread:$0]  %s93_s21, 128, %s194_s3, [#allocation3]  }
  0xe8   :  { %142 = dma.done.wait [#allocation3], 128  }
  0xe9   :  { %143 = vsyncadd [#allocation3], 4294967168 }
  0xea   :  { %99 = vsyncpa [#allocation3], 1 }

</bundles_post_ra>
